<compile_context>
chip_gen: v6e
topology: v6e:2x2x1
jax: 0.10.0
libtpu: 0.0.40
codegen_flags: <defaults>
</compile_context>

<pallas_src>
import functools

import jax
import jax.numpy as jnp
from jax.experimental import pallas as pl
from jax.experimental.pallas import tpu as pltpu


# -----------------------------------------------------------------------------
# Kernel: one grid step == one batch element, everything VMEM/vreg resident.
# -----------------------------------------------------------------------------
def _mra_bgcn_kernel(*refs, K, D, Ce):
    f32 = jnp.float32

    it = iter(refs)
    x_ref = next(it)        # (1, N, Cin)  this batch element's input
    an_ref = next(it)       # (N, N)       node adjacency
    ae_ref = next(it)       # (E, E)       edge adjacency
    mt_ref = next(it)       # (E, N)       M^T
    mn_ref = next(it)       # (N, E)       M
    wb_ref = next(it)       # (Cin, Ce)    edge projection weight
    layers = []
    for _ in range(K):
        we = next(it)       # (Ce, Ce)
        be = next(it)       # (1, Ce)
        wn = next(it)       # (Cin, D) for k==0 else (D+Ce, D)
        bn = next(it)       # (1, D)
        layers.append((we, be, wn, bn))
    v_ref = next(it)        # (D, 1)       W_a @ U (folded at trace time)
    o_ref = next(it)        # (1, N, D)    output for this batch element
    cat_ref = next(it)      # (N, D+Ce)    VMEM scratch for fused propagation

    x = x_ref[0]                                                   # (N, Cin)

    # Edge feature projection: Z0 = (M^T X) W_b   (M^T read at its only use)
    z = jnp.dot(jnp.dot(mt_ref[...], x, preferred_element_type=f32),
                wb_ref[...], preferred_element_type=f32)           # (E, Ce)

    an = an_ref[...]
    ae = ae_ref[...]

    xk = x
    xs = []
    for k in range(K):
        we_ref, be_ref, wn_ref, bn_ref = layers[k]
        hops = k + 1

        # ---- edge-graph GCN: Z <- relu((A_e^{k+1} Z) W_e + b_e) ----
        h = z
        for _ in range(hops):
            h = jnp.dot(ae, h, preferred_element_type=f32)
        z = jnp.maximum(
            jnp.dot(h, we_ref[...], preferred_element_type=f32) + be_ref[...],
            0.0)

        # ---- node-graph GCN ----
        if k == 0:
            h = jnp.dot(an, xk, preferred_element_type=f32)
        else:
            # concat([Xk, M @ Z]) built with two lane-slice stores; every hop
            # is then ONE wide A_node matmul instead of two narrow ones, and
            # the projection uses the full (D+Ce, D) weight in one matmul.
            mz = jnp.dot(mn_ref[...], z, preferred_element_type=f32)  # (N, Ce)
            cat_ref[:, 0:D] = xk
            cat_ref[:, D:D + Ce] = mz
            h = cat_ref[...]                                          # (N, D+Ce)
            for _ in range(hops):
                h = jnp.dot(an, h, preferred_element_type=f32)
        xk = jnp.maximum(
            jnp.dot(h, wn_ref[...], preferred_element_type=f32) + bn_ref[...],
            0.0)
        xs.append(xk)

    # ---- multi-range attention: narrow (N, 1) logits, softmax over K ----
    v = v_ref[...]                                                   # (D, 1)
    es = [jnp.dot(xr, v, preferred_element_type=f32) for xr in xs]   # (N, 1)
    m = es[0]
    for e in es[1:]:
        m = jnp.maximum(m, e)
    ps = [jnp.exp(e - m) for e in es]
    den = ps[0]
    for p in ps[1:]:
        den = den + p
    h = ps[0] * xs[0]
    for p, xr in zip(ps[1:], xs[1:]):
        h = h + p * xr
    o_ref[0] = h / den                                               # (N, D)


# -----------------------------------------------------------------------------
# Size-aware VMEM budget and cost estimate
# -----------------------------------------------------------------------------
def _vmem_limit_bytes(N, E, Cin, D, Ce, K):
    need = 4 * (N * N + E * E + 2 * N * E
                + N * Cin + Cin * Ce + E * Ce
                + K * (Ce * Ce + Ce + (D + Ce) * D + D)
                + (K + 4) * N * (D + Ce) + D)
    need = 2 * need + (1 << 20)                 # double-buffering + headroom
    # Cap at 56 MiB so the same budget also fits v7x's 64 MiB physical VMEM.
    return int(min(56 << 20, max(32 << 20, need)))


def _cost_estimate(B, N, E, Cin, D, Ce, K):
    flops = 2 * E * N * Cin + 2 * E * Cin * Ce            # edge projection
    for k in range(K):
        hops = k + 1
        flops += hops * 2 * E * E * Ce + 2 * E * Ce * Ce  # edge GCN
        if k == 0:
            flops += 2 * N * N * Cin + 2 * N * Cin * D
        else:
            flops += (2 * N * E * Ce + hops * 2 * N * N * (D + Ce)
                      + 2 * N * (D + Ce) * D)
    flops += K * 4 * N * D                                 # logits + mix
    flops *= B
    weight_elems = Cin * Ce + D + K * (Ce * Ce + Ce + (D + Ce) * D + D)
    bytes_accessed = 4 * (B * N * Cin + B * N * D
                          + N * N + E * E + 2 * N * E + weight_elems)
    return pl.CostEstimate(flops=int(flops),
                           transcendentals=int(B * K * N),
                           bytes_accessed=int(bytes_accessed))


# -----------------------------------------------------------------------------
# Wrapper: trace-time parameter packing + the single batch-gridded pallas_call
# -----------------------------------------------------------------------------
def mra_bgcn_forward(params, X, A_node, A_edge, M, *, K):
    B, N, Cin = X.shape
    D = params["W_a"].shape[0]
    Ce = params["W_b"].shape[1]
    E = A_edge.shape[0]
    f32 = jnp.float32

    def full(*shape):
        return pl.BlockSpec(shape, lambda b, _r=len(shape): (0,) * _r)

    args = [
        X.astype(f32),
        A_node.astype(f32),
        A_edge.astype(f32),
        M.T.astype(f32),
        M.astype(f32),
        params["W_b"].astype(f32),
    ]
    in_specs = [
        pl.BlockSpec((1, N, Cin), lambda b: (b, 0, 0)),
        full(N, N), full(E, E), full(E, N), full(N, E), full(Cin, Ce),
    ]
    for k in range(K):
        We, be = params["edge"][k]
        Wn, bn = params["node"][k]
        din = Cin if k == 0 else D + Ce
        args += [We.astype(f32), be.astype(f32).reshape(1, Ce),
                 Wn.astype(f32), bn.astype(f32).reshape(1, D)]
        in_specs += [full(Ce, Ce), full(1, Ce), full(din, D), full(1, D)]

    # Fold W_a @ U once at trace time -> narrow logit projector (D, 1).
    v = (params["W_a"].astype(f32) @ params["U"].astype(f32)).reshape(D, 1)
    args.append(v)
    in_specs.append(full(D, 1))

    kernel = functools.partial(_mra_bgcn_kernel, K=K, D=D, Ce=Ce)
    out = pl.pallas_call(
        kernel,
        grid=(B,),
        in_specs=in_specs,
        out_specs=pl.BlockSpec((1, N, D), lambda b: (b, 0, 0)),
        out_shape=jax.ShapeDtypeStruct((B, N, D), f32),
        scratch_shapes=[pltpu.VMEM((N, D + Ce), f32)],
        compiler_params=pltpu.CompilerParams(
            dimension_semantics=("parallel",),
            vmem_limit_bytes=_vmem_limit_bytes(N, E, Cin, D, Ce, K)),
        cost_estimate=_cost_estimate(B, N, E, Cin, D, Ce, K),
    )(*args)
    return out                                             # (B, N, D)


# -----------------------------------------------------------------------------
# Parameter init
# -----------------------------------------------------------------------------
def init_params(key, dim_in_node, dim_out, dim_out_edge, K):
    def nrm(k, shape, scale=0.1):
        return scale * jax.random.normal(k, shape, dtype=jnp.float32)

    keys = iter(jax.random.split(key, 3 + 4 * K))
    params = {
        "W_a": nrm(next(keys), (dim_out, dim_out)),
        "U": nrm(next(keys), (dim_out,)),
        "W_b": nrm(next(keys), (dim_in_node, dim_out_edge)),
        "node": [],
        "edge": [],
    }
    for k in range(K):
        din = dim_in_node if k == 0 else dim_out + dim_out_edge
        params["node"].append((nrm(next(keys), (din, dim_out)),
                               nrm(next(keys), (dim_out,))))
        params["edge"].append((nrm(next(keys), (dim_out_edge, dim_out_edge)),
                               nrm(next(keys), (dim_out_edge,))))
    return params


# -----------------------------------------------------------------------------
# Pure-JAX f32 reference (same inferred GCN semantics) for correctness check
# -----------------------------------------------------------------------------
def mra_bgcn_reference(params, X, A_node, A_edge, M, K):
    Z = jnp.einsum('en,bnc,cf->bef', M.T, X, params["W_b"])
    Xs = []
    Xk = X
    for k in range(K):
        We, be = params["edge"][k]
        H = Z
        for _ in range(k + 1):
            H = jnp.einsum('ef,bfc->bec', A_edge, H)
        Z = jax.nn.relu(H @ We + be)
        Wn, bn = params["node"][k]
        if k == 0:
            H = jnp.einsum('nm,bmc->bnc', A_node, Xk)
        else:
            H = jnp.concatenate([Xk, jnp.einsum('ne,bec->bnc', M, Z)], -1)
            for _ in range(k + 1):
                H = jnp.einsum('nm,bmc->bnc', A_node, H)
        Xk = jax.nn.relu(H @ Wn + bn)
        Xs.append(Xk)
    Xs = jnp.stack(Xs)                                       # (K, B, N, D)
    e = jnp.einsum('kbnd,d->kbn', Xs @ params["W_a"], params["U"])
    alpha = jax.nn.softmax(e, axis=0)
    return jnp.einsum('kbn,kbnd->bnd', alpha, Xs)


if __name__ == "__main__":
    B, N, E = 2, 8, 12
    dim_in_node, dim_out, dim_out_edge, K = 4, 16, 8, 3

    key = jax.random.PRNGKey(0)
    k_an, k_ae, k_m, k_x, k_p = jax.random.split(key, 5)

    A_node = jax.random.uniform(k_an, (N, N), dtype=jnp.float32)
    A_node = A_node / jnp.sum(A_node, axis=1, keepdims=True)
    A_edge = jax.random.uniform(k_ae, (E, E), dtype=jnp.float32)
    A_edge = A_edge / jnp.sum(A_edge, axis=1, keepdims=True)
    M = (jax.random.uniform(k_m, (N, E)) > 0.5).astype(jnp.float32)
    X = jax.random.normal(k_x, (B, N, dim_in_node), dtype=jnp.float32)

    params = init_params(k_p, dim_in_node, dim_out, dim_out_edge, K)

    fwd = jax.jit(mra_bgcn_forward, static_argnames="K")
    h = jax.block_until_ready(fwd(params, X, A_node, A_edge, M, K=K))
    assert h.shape == (B, N, dim_out), h.shape
    assert bool(jnp.all(jnp.isfinite(h)))

    # f32 end-to-end -> tight agreement with the pure-JAX reference.
    ref = mra_bgcn_reference(params, X, A_node, A_edge, M, K)
    err = float(jnp.max(jnp.abs(h - ref)))
    scale = float(jnp.max(jnp.abs(ref))) + 1.0
    assert err < 1e-3 * scale, f"max abs err {err} (scale {scale})"

    print("KERNEL_OK")
</pallas_src>

<mosaic_0001>
module attributes {stable_mosaic.version = 11 : i64} {
  func.func @_mra_bgcn_kernel(%arg0: i32, %arg1: memref<1x8x4xf32, #tpu.memory_space<vmem>>, %arg2: memref<8x8xf32, #tpu.memory_space<vmem>>, %arg3: memref<12x12xf32, #tpu.memory_space<vmem>>, %arg4: memref<12x8xf32, #tpu.memory_space<vmem>>, %arg5: memref<8x12xf32, #tpu.memory_space<vmem>>, %arg6: memref<4x8xf32, #tpu.memory_space<vmem>>, %arg7: memref<8x8xf32, #tpu.memory_space<vmem>>, %arg8: memref<1x8xf32, #tpu.memory_space<vmem>>, %arg9: memref<4x16xf32, #tpu.memory_space<vmem>>, %arg10: memref<1x16xf32, #tpu.memory_space<vmem>>, %arg11: memref<8x8xf32, #tpu.memory_space<vmem>>, %arg12: memref<1x8xf32, #tpu.memory_space<vmem>>, %arg13: memref<24x16xf32, #tpu.memory_space<vmem>>, %arg14: memref<1x16xf32, #tpu.memory_space<vmem>>, %arg15: memref<8x8xf32, #tpu.memory_space<vmem>>, %arg16: memref<1x8xf32, #tpu.memory_space<vmem>>, %arg17: memref<24x16xf32, #tpu.memory_space<vmem>>, %arg18: memref<1x16xf32, #tpu.memory_space<vmem>>, %arg19: memref<16x1xf32, #tpu.memory_space<vmem>>, %arg20: memref<1x8x16xf32, #tpu.memory_space<vmem>>, %arg21: memref<8x24xf32, #tpu.memory_space<vmem>>) attributes {dimension_semantics = [#tpu.dimension_semantics<parallel>], iteration_bounds = array<i64: 2>, scalar_prefetch = 0 : i64, scratch_operands = 1 : i64, tpu.core_type = #tpu.core_type<tc>, window_params = [{transform_indices = @transform_0, window_bounds = array<i64: 1, 8, 4>}, {pipeline_mode = #tpu.pipeline_mode<synchronous>, transform_indices = @transform_1, window_bounds = array<i64: 8, 8>}, {pipeline_mode = #tpu.pipeline_mode<synchronous>, transform_indices = @transform_2, window_bounds = array<i64: 12, 12>}, {pipeline_mode = #tpu.pipeline_mode<synchronous>, transform_indices = @transform_3, window_bounds = array<i64: 12, 8>}, {pipeline_mode = #tpu.pipeline_mode<synchronous>, transform_indices = @transform_4, window_bounds = array<i64: 8, 12>}, {pipeline_mode = #tpu.pipeline_mode<synchronous>, transform_indices = @transform_5, window_bounds = array<i64: 4, 8>}, {pipeline_mode = #tpu.pipeline_mode<synchronous>, transform_indices = @transform_6, window_bounds = array<i64: 8, 8>}, {pipeline_mode = #tpu.pipeline_mode<synchronous>, transform_indices = @transform_7, window_bounds = array<i64: 1, 8>}, {pipeline_mode = #tpu.pipeline_mode<synchronous>, transform_indices = @transform_8, window_bounds = array<i64: 4, 16>}, {pipeline_mode = #tpu.pipeline_mode<synchronous>, transform_indices = @transform_9, window_bounds = array<i64: 1, 16>}, {pipeline_mode = #tpu.pipeline_mode<synchronous>, transform_indices = @transform_10, window_bounds = array<i64: 8, 8>}, {pipeline_mode = #tpu.pipeline_mode<synchronous>, transform_indices = @transform_11, window_bounds = array<i64: 1, 8>}, {pipeline_mode = #tpu.pipeline_mode<synchronous>, transform_indices = @transform_12, window_bounds = array<i64: 24, 16>}, {pipeline_mode = #tpu.pipeline_mode<synchronous>, transform_indices = @transform_13, window_bounds = array<i64: 1, 16>}, {pipeline_mode = #tpu.pipeline_mode<synchronous>, transform_indices = @transform_14, window_bounds = array<i64: 8, 8>}, {pipeline_mode = #tpu.pipeline_mode<synchronous>, transform_indices = @transform_15, window_bounds = array<i64: 1, 8>}, {pipeline_mode = #tpu.pipeline_mode<synchronous>, transform_indices = @transform_16, window_bounds = array<i64: 24, 16>}, {pipeline_mode = #tpu.pipeline_mode<synchronous>, transform_indices = @transform_17, window_bounds = array<i64: 1, 16>}, {pipeline_mode = #tpu.pipeline_mode<synchronous>, transform_indices = @transform_18, window_bounds = array<i64: 16, 1>}, {transform_indices = @transform_19, window_bounds = array<i64: 1, 8, 16>}]} {
    %c0 = arith.constant 0 : index
    %c0_0 = arith.constant 0 : index
    %c0_1 = arith.constant 0 : index
    %0 = vector.load %arg1[%c0, %c0_0, %c0_1] : memref<1x8x4xf32, #tpu.memory_space<vmem>>, vector<1x8x4xf32>
    %1 = vector.shape_cast %0 : vector<1x8x4xf32> to vector<8x4xf32>
    %c0_2 = arith.constant 0 : index
    %c0_3 = arith.constant 0 : index
    %2 = vector.load %arg4[%c0_2, %c0_3] : memref<12x8xf32, #tpu.memory_space<vmem>>, vector<12x8xf32>
    %cst = arith.constant dense<0.000000e+00> : vector<12x4xf32>
    %3 = tpu.matmul %2, %1, %cst {dimension_numbers = #tpu.dot_dimension_numbers<[1], [0], [0], [1], [0, 0, 1, 1], [], []>} : vector<12x8xf32>, vector<8x4xf32>, vector<12x4xf32> -> vector<12x4xf32>
    %c0_4 = arith.constant 0 : index
    %c0_5 = arith.constant 0 : index
    %4 = vector.load %arg6[%c0_4, %c0_5] : memref<4x8xf32, #tpu.memory_space<vmem>>, vector<4x8xf32>
    %cst_6 = arith.constant dense<0.000000e+00> : vector<12x8xf32>
    %5 = tpu.matmul %3, %4, %cst_6 {dimension_numbers = #tpu.dot_dimension_numbers<[1], [0], [0], [1], [0, 0, 1, 1], [], []>} : vector<12x4xf32>, vector<4x8xf32>, vector<12x8xf32> -> vector<12x8xf32>
    %c0_7 = arith.constant 0 : index
    %c0_8 = arith.constant 0 : index
    %6 = vector.load %arg2[%c0_7, %c0_8] : memref<8x8xf32, #tpu.memory_space<vmem>>, vector<8x8xf32>
    %c0_9 = arith.constant 0 : index
    %c0_10 = arith.constant 0 : index
    %7 = vector.load %arg3[%c0_9, %c0_10] : memref<12x12xf32, #tpu.memory_space<vmem>>, vector<12x12xf32>
    %cst_11 = arith.constant dense<0.000000e+00> : vector<12x8xf32>
    %8 = tpu.matmul %7, %5, %cst_11 {dimension_numbers = #tpu.dot_dimension_numbers<[1], [0], [0], [1], [0, 0, 1, 1], [], []>} : vector<12x12xf32>, vector<12x8xf32>, vector<12x8xf32> -> vector<12x8xf32>
    %c0_12 = arith.constant 0 : index
    %c0_13 = arith.constant 0 : index
    %9 = vector.load %arg7[%c0_12, %c0_13] : memref<8x8xf32, #tpu.memory_space<vmem>>, vector<8x8xf32>
    %cst_14 = arith.constant dense<0.000000e+00> : vector<12x8xf32>
    %10 = tpu.matmul %8, %9, %cst_14 {dimension_numbers = #tpu.dot_dimension_numbers<[1], [0], [0], [1], [0, 0, 1, 1], [], []>} : vector<12x8xf32>, vector<8x8xf32>, vector<12x8xf32> -> vector<12x8xf32>
    %c0_15 = arith.constant 0 : index
    %c0_16 = arith.constant 0 : index
    %11 = vector.load %arg8[%c0_15, %c0_16] : memref<1x8xf32, #tpu.memory_space<vmem>>, vector<1x8xf32>
    %12 = vector.broadcast %11 : vector<1x8xf32> to vector<12x8xf32>
    %13 = arith.addf %10, %12 : vector<12x8xf32>
    %cst_17 = arith.constant 0.000000e+00 : f32
    %14 = vector.broadcast %cst_17 : f32 to vector<12x8xf32>
    %15 = arith.maximumf %13, %14 : vector<12x8xf32>
    %cst_18 = arith.constant dense<0.000000e+00> : vector<8x4xf32>
    %16 = tpu.matmul %6, %1, %cst_18 {dimension_numbers = #tpu.dot_dimension_numbers<[1], [0], [0], [1], [0, 0, 1, 1], [], []>} : vector<8x8xf32>, vector<8x4xf32>, vector<8x4xf32> -> vector<8x4xf32>
    %c0_19 = arith.constant 0 : index
    %c0_20 = arith.constant 0 : index
    %17 = vector.load %arg9[%c0_19, %c0_20] : memref<4x16xf32, #tpu.memory_space<vmem>>, vector<4x16xf32>
    %cst_21 = arith.constant dense<0.000000e+00> : vector<8x16xf32>
    %18 = tpu.matmul %16, %17, %cst_21 {dimension_numbers = #tpu.dot_dimension_numbers<[1], [0], [0], [1], [0, 0, 1, 1], [], []>} : vector<8x4xf32>, vector<4x16xf32>, vector<8x16xf32> -> vector<8x16xf32>
    %c0_22 = arith.constant 0 : index
    %c0_23 = arith.constant 0 : index
    %19 = vector.load %arg10[%c0_22, %c0_23] : memref<1x16xf32, #tpu.memory_space<vmem>>, vector<1x16xf32>
    %20 = vector.broadcast %19 : vector<1x16xf32> to vector<8x16xf32>
    %21 = arith.addf %18, %20 : vector<8x16xf32>
    %cst_24 = arith.constant 0.000000e+00 : f32
    %22 = vector.broadcast %cst_24 : f32 to vector<8x16xf32>
    %23 = arith.maximumf %21, %22 : vector<8x16xf32>
    %cst_25 = arith.constant dense<0.000000e+00> : vector<12x8xf32>
    %24 = tpu.matmul %7, %15, %cst_25 {dimension_numbers = #tpu.dot_dimension_numbers<[1], [0], [0], [1], [0, 0, 1, 1], [], []>} : vector<12x12xf32>, vector<12x8xf32>, vector<12x8xf32> -> vector<12x8xf32>
    %cst_26 = arith.constant dense<0.000000e+00> : vector<12x8xf32>
    %25 = tpu.matmul %7, %24, %cst_26 {dimension_numbers = #tpu.dot_dimension_numbers<[1], [0], [0], [1], [0, 0, 1, 1], [], []>} : vector<12x12xf32>, vector<12x8xf32>, vector<12x8xf32> -> vector<12x8xf32>
    %c0_27 = arith.constant 0 : index
    %c0_28 = arith.constant 0 : index
    %26 = vector.load %arg11[%c0_27, %c0_28] : memref<8x8xf32, #tpu.memory_space<vmem>>, vector<8x8xf32>
    %cst_29 = arith.constant dense<0.000000e+00> : vector<12x8xf32>
    %27 = tpu.matmul %25, %26, %cst_29 {dimension_numbers = #tpu.dot_dimension_numbers<[1], [0], [0], [1], [0, 0, 1, 1], [], []>} : vector<12x8xf32>, vector<8x8xf32>, vector<12x8xf32> -> vector<12x8xf32>
    %c0_30 = arith.constant 0 : index
    %c0_31 = arith.constant 0 : index
    %28 = vector.load %arg12[%c0_30, %c0_31] : memref<1x8xf32, #tpu.memory_space<vmem>>, vector<1x8xf32>
    %29 = vector.broadcast %28 : vector<1x8xf32> to vector<12x8xf32>
    %30 = arith.addf %27, %29 : vector<12x8xf32>
    %cst_32 = arith.constant 0.000000e+00 : f32
    %31 = vector.broadcast %cst_32 : f32 to vector<12x8xf32>
    %32 = arith.maximumf %30, %31 : vector<12x8xf32>
    %c0_33 = arith.constant 0 : index
    %c0_34 = arith.constant 0 : index
    %33 = vector.load %arg5[%c0_33, %c0_34] : memref<8x12xf32, #tpu.memory_space<vmem>>, vector<8x12xf32>
    %cst_35 = arith.constant dense<0.000000e+00> : vector<8x8xf32>
    %34 = tpu.matmul %33, %32, %cst_35 {dimension_numbers = #tpu.dot_dimension_numbers<[1], [0], [0], [1], [0, 0, 1, 1], [], []>} : vector<8x12xf32>, vector<12x8xf32>, vector<8x8xf32> -> vector<8x8xf32>
    %c0_36 = arith.constant 0 : index
    %c0_37 = arith.constant 0 : index
    %35 = vector.load %arg21[%c0_36, %c0_37] : memref<8x24xf32, #tpu.memory_space<vmem>>, vector<8x16xf32>
    tpu.vector_store %arg21[%c0_36, %c0_37], %23 {strides = array<i32>} : memref<8x24xf32, #tpu.memory_space<vmem>>, vector<8x16xf32>,
    %c0_38 = arith.constant 0 : index
    %c16 = arith.constant 16 : index
    %36 = vector.load %arg21[%c0_38, %c16] : memref<8x24xf32, #tpu.memory_space<vmem>>, vector<8x8xf32>
    tpu.vector_store %arg21[%c0_38, %c16], %34 {strides = array<i32>} : memref<8x24xf32, #tpu.memory_space<vmem>>, vector<8x8xf32>,
    %c0_39 = arith.constant 0 : index
    %c0_40 = arith.constant 0 : index
    %37 = vector.load %arg21[%c0_39, %c0_40] : memref<8x24xf32, #tpu.memory_space<vmem>>, vector<8x24xf32>
    %cst_41 = arith.constant dense<0.000000e+00> : vector<8x24xf32>
    %38 = tpu.matmul %6, %37, %cst_41 {dimension_numbers = #tpu.dot_dimension_numbers<[1], [0], [0], [1], [0, 0, 1, 1], [], []>} : vector<8x8xf32>, vector<8x24xf32>, vector<8x24xf32> -> vector<8x24xf32>
    %cst_42 = arith.constant dense<0.000000e+00> : vector<8x24xf32>
    %39 = tpu.matmul %6, %38, %cst_42 {dimension_numbers = #tpu.dot_dimension_numbers<[1], [0], [0], [1], [0, 0, 1, 1], [], []>} : vector<8x8xf32>, vector<8x24xf32>, vector<8x24xf32> -> vector<8x24xf32>
    %c0_43 = arith.constant 0 : index
    %c0_44 = arith.constant 0 : index
    %40 = vector.load %arg13[%c0_43, %c0_44] : memref<24x16xf32, #tpu.memory_space<vmem>>, vector<24x16xf32>
    %cst_45 = arith.constant dense<0.000000e+00> : vector<8x16xf32>
    %41 = tpu.matmul %39, %40, %cst_45 {dimension_numbers = #tpu.dot_dimension_numbers<[1], [0], [0], [1], [0, 0, 1, 1], [], []>} : vector<8x24xf32>, vector<24x16xf32>, vector<8x16xf32> -> vector<8x16xf32>
    %c0_46 = arith.constant 0 : index
    %c0_47 = arith.constant 0 : index
    %42 = vector.load %arg14[%c0_46, %c0_47] : memref<1x16xf32, #tpu.memory_space<vmem>>, vector<1x16xf32>
    %43 = vector.broadcast %42 : vector<1x16xf32> to vector<8x16xf32>
    %44 = arith.addf %41, %43 : vector<8x16xf32>
    %cst_48 = arith.constant 0.000000e+00 : f32
    %45 = vector.broadcast %cst_48 : f32 to vector<8x16xf32>
    %46 = arith.maximumf %44, %45 : vector<8x16xf32>
    %cst_49 = arith.constant dense<0.000000e+00> : vector<12x8xf32>
    %47 = tpu.matmul %7, %32, %cst_49 {dimension_numbers = #tpu.dot_dimension_numbers<[1], [0], [0], [1], [0, 0, 1, 1], [], []>} : vector<12x12xf32>, vector<12x8xf32>, vector<12x8xf32> -> vector<12x8xf32>
    %cst_50 = arith.constant dense<0.000000e+00> : vector<12x8xf32>
    %48 = tpu.matmul %7, %47, %cst_50 {dimension_numbers = #tpu.dot_dimension_numbers<[1], [0], [0], [1], [0, 0, 1, 1], [], []>} : vector<12x12xf32>, vector<12x8xf32>, vector<12x8xf32> -> vector<12x8xf32>
    %cst_51 = arith.constant dense<0.000000e+00> : vector<12x8xf32>
    %49 = tpu.matmul %7, %48, %cst_51 {dimension_numbers = #tpu.dot_dimension_numbers<[1], [0], [0], [1], [0, 0, 1, 1], [], []>} : vector<12x12xf32>, vector<12x8xf32>, vector<12x8xf32> -> vector<12x8xf32>
    %c0_52 = arith.constant 0 : index
    %c0_53 = arith.constant 0 : index
    %50 = vector.load %arg15[%c0_52, %c0_53] : memref<8x8xf32, #tpu.memory_space<vmem>>, vector<8x8xf32>
    %cst_54 = arith.constant dense<0.000000e+00> : vector<12x8xf32>
    %51 = tpu.matmul %49, %50, %cst_54 {dimension_numbers = #tpu.dot_dimension_numbers<[1], [0], [0], [1], [0, 0, 1, 1], [], []>} : vector<12x8xf32>, vector<8x8xf32>, vector<12x8xf32> -> vector<12x8xf32>
    %c0_55 = arith.constant 0 : index
    %c0_56 = arith.constant 0 : index
    %52 = vector.load %arg16[%c0_55, %c0_56] : memref<1x8xf32, #tpu.memory_space<vmem>>, vector<1x8xf32>
    %53 = vector.broadcast %52 : vector<1x8xf32> to vector<12x8xf32>
    %54 = arith.addf %51, %53 : vector<12x8xf32>
    %cst_57 = arith.constant 0.000000e+00 : f32
    %55 = vector.broadcast %cst_57 : f32 to vector<12x8xf32>
    %56 = arith.maximumf %54, %55 : vector<12x8xf32>
    %c0_58 = arith.constant 0 : index
    %c0_59 = arith.constant 0 : index
    %57 = vector.load %arg5[%c0_58, %c0_59] : memref<8x12xf32, #tpu.memory_space<vmem>>, vector<8x12xf32>
    %cst_60 = arith.constant dense<0.000000e+00> : vector<8x8xf32>
    %58 = tpu.matmul %57, %56, %cst_60 {dimension_numbers = #tpu.dot_dimension_numbers<[1], [0], [0], [1], [0, 0, 1, 1], [], []>} : vector<8x12xf32>, vector<12x8xf32>, vector<8x8xf32> -> vector<8x8xf32>
    %c0_61 = arith.constant 0 : index
    %c0_62 = arith.constant 0 : index
    %59 = vector.load %arg21[%c0_61, %c0_62] : memref<8x24xf32, #tpu.memory_space<vmem>>, vector<8x16xf32>
    tpu.vector_store %arg21[%c0_61, %c0_62], %46 {strides = array<i32>} : memref<8x24xf32, #tpu.memory_space<vmem>>, vector<8x16xf32>,
    %c0_63 = arith.constant 0 : index
    %c16_64 = arith.constant 16 : index
    %60 = vector.load %arg21[%c0_63, %c16_64] : memref<8x24xf32, #tpu.memory_space<vmem>>, vector<8x8xf32>
    tpu.vector_store %arg21[%c0_63, %c16_64], %58 {strides = array<i32>} : memref<8x24xf32, #tpu.memory_space<vmem>>, vector<8x8xf32>,
    %c0_65 = arith.constant 0 : index
    %c0_66 = arith.constant 0 : index
    %61 = vector.load %arg21[%c0_65, %c0_66] : memref<8x24xf32, #tpu.memory_space<vmem>>, vector<8x24xf32>
    %cst_67 = arith.constant dense<0.000000e+00> : vector<8x24xf32>
    %62 = tpu.matmul %6, %61, %cst_67 {dimension_numbers = #tpu.dot_dimension_numbers<[1], [0], [0], [1], [0, 0, 1, 1], [], []>} : vector<8x8xf32>, vector<8x24xf32>, vector<8x24xf32> -> vector<8x24xf32>
    %cst_68 = arith.constant dense<0.000000e+00> : vector<8x24xf32>
    %63 = tpu.matmul %6, %62, %cst_68 {dimension_numbers = #tpu.dot_dimension_numbers<[1], [0], [0], [1], [0, 0, 1, 1], [], []>} : vector<8x8xf32>, vector<8x24xf32>, vector<8x24xf32> -> vector<8x24xf32>
    %cst_69 = arith.constant dense<0.000000e+00> : vector<8x24xf32>
    %64 = tpu.matmul %6, %63, %cst_69 {dimension_numbers = #tpu.dot_dimension_numbers<[1], [0], [0], [1], [0, 0, 1, 1], [], []>} : vector<8x8xf32>, vector<8x24xf32>, vector<8x24xf32> -> vector<8x24xf32>
    %c0_70 = arith.constant 0 : index
    %c0_71 = arith.constant 0 : index
    %65 = vector.load %arg17[%c0_70, %c0_71] : memref<24x16xf32, #tpu.memory_space<vmem>>, vector<24x16xf32>
    %cst_72 = arith.constant dense<0.000000e+00> : vector<8x16xf32>
    %66 = tpu.matmul %64, %65, %cst_72 {dimension_numbers = #tpu.dot_dimension_numbers<[1], [0], [0], [1], [0, 0, 1, 1], [], []>} : vector<8x24xf32>, vector<24x16xf32>, vector<8x16xf32> -> vector<8x16xf32>
    %c0_73 = arith.constant 0 : index
    %c0_74 = arith.constant 0 : index
    %67 = vector.load %arg18[%c0_73, %c0_74] : memref<1x16xf32, #tpu.memory_space<vmem>>, vector<1x16xf32>
    %68 = vector.broadcast %67 : vector<1x16xf32> to vector<8x16xf32>
    %69 = arith.addf %66, %68 : vector<8x16xf32>
    %cst_75 = arith.constant 0.000000e+00 : f32
    %70 = vector.broadcast %cst_75 : f32 to vector<8x16xf32>
    %71 = arith.maximumf %69, %70 : vector<8x16xf32>
    %c0_76 = arith.constant 0 : index
    %c0_77 = arith.constant 0 : index
    %72 = vector.load %arg19[%c0_76, %c0_77] : memref<16x1xf32, #tpu.memory_space<vmem>>, vector<16x1xf32>
    %cst_78 = arith.constant dense<0.000000e+00> : vector<8x1xf32>
    %73 = tpu.matmul %23, %72, %cst_78 {dimension_numbers = #tpu.dot_dimension_numbers<[1], [0], [0], [1], [0, 0, 1, 1], [], []>} : vector<8x16xf32>, vector<16x1xf32>, vector<8x1xf32> -> vector<8x1xf32>
    %cst_79 = arith.constant dense<0.000000e+00> : vector<8x1xf32>
    %74 = tpu.matmul %46, %72, %cst_79 {dimension_numbers = #tpu.dot_dimension_numbers<[1], [0], [0], [1], [0, 0, 1, 1], [], []>} : vector<8x16xf32>, vector<16x1xf32>, vector<8x1xf32> -> vector<8x1xf32>
    %cst_80 = arith.constant dense<0.000000e+00> : vector<8x1xf32>
    %75 = tpu.matmul %71, %72, %cst_80 {dimension_numbers = #tpu.dot_dimension_numbers<[1], [0], [0], [1], [0, 0, 1, 1], [], []>} : vector<8x16xf32>, vector<16x1xf32>, vector<8x1xf32> -> vector<8x1xf32>
    %76 = arith.maximumf %73, %74 : vector<8x1xf32>
    %77 = arith.maximumf %76, %75 : vector<8x1xf32>
    %78 = arith.subf %73, %77 : vector<8x1xf32>
    %79 = math.exp %78 : vector<8x1xf32>
    %80 = arith.subf %74, %77 : vector<8x1xf32>
    %81 = math.exp %80 : vector<8x1xf32>
    %82 = arith.subf %75, %77 : vector<8x1xf32>
    %83 = math.exp %82 : vector<8x1xf32>
    %84 = arith.addf %79, %81 : vector<8x1xf32>
    %85 = arith.addf %84, %83 : vector<8x1xf32>
    %86 = vector.broadcast %79 : vector<8x1xf32> to vector<8x16xf32>
    %87 = arith.mulf %86, %23 : vector<8x16xf32>
    %88 = vector.broadcast %81 : vector<8x1xf32> to vector<8x16xf32>
    %89 = arith.mulf %88, %46 : vector<8x16xf32>
    %90 = arith.addf %87, %89 : vector<8x16xf32>
    %91 = vector.broadcast %83 : vector<8x1xf32> to vector<8x16xf32>
    %92 = arith.mulf %91, %71 : vector<8x16xf32>
    %93 = arith.addf %90, %92 : vector<8x16xf32>
    %94 = vector.broadcast %85 : vector<8x1xf32> to vector<8x16xf32>
    %95 = arith.divf %93, %94 : vector<8x16xf32>
    %c0_81 = arith.constant 0 : index
    %c0_82 = arith.constant 0 : index
    %c0_83 = arith.constant 0 : index
    %96 = vector.load %arg20[%c0_81, %c0_82, %c0_83] : memref<1x8x16xf32, #tpu.memory_space<vmem>>, vector<1x8x16xf32>
    %97 = vector.shape_cast %96 : vector<1x8x16xf32> to vector<8x16xf32>
    %98 = vector.shape_cast %95 : vector<8x16xf32> to vector<1x8x16xf32>
    tpu.vector_store %arg20[%c0_81, %c0_82, %c0_83], %98 {strides = array<i32>} : memref<1x8x16xf32, #tpu.memory_space<vmem>>, vector<1x8x16xf32>,
    return
  }
  func.func @transform_0(%arg0: i32) -> (i32, i32, i32) {
    %c0_i32 = arith.constant 0 : i32
    %c0_i32_0 = arith.constant 0 : i32
    %c0_i32_1 = arith.constant 0 : i32
    return %arg0, %c0_i32, %c0_i32_0 : i32, i32, i32
  }
  func.func @transform_1(%arg0: i32) -> (i32, i32) {
    %c0_i32 = arith.constant 0 : i32
    %c0_i32_0 = arith.constant 0 : i32
    %c0_i32_1 = arith.constant 0 : i32
    return %c0_i32, %c0_i32_0 : i32, i32
  }
  func.func @transform_2(%arg0: i32) -> (i32, i32) {
    %c0_i32 = arith.constant 0 : i32
    %c0_i32_0 = arith.constant 0 : i32
    %c0_i32_1 = arith.constant 0 : i32
    return %c0_i32, %c0_i32_0 : i32, i32
  }
  func.func @transform_3(%arg0: i32) -> (i32, i32) {
    %c0_i32 = arith.constant 0 : i32
    %c0_i32_0 = arith.constant 0 : i32
    %c0_i32_1 = arith.constant 0 : i32
    return %c0_i32, %c0_i32_0 : i32, i32
  }
  func.func @transform_4(%arg0: i32) -> (i32, i32) {
    %c0_i32 = arith.constant 0 : i32
    %c0_i32_0 = arith.constant 0 : i32
    %c0_i32_1 = arith.constant 0 : i32
    return %c0_i32, %c0_i32_0 : i32, i32
  }
  func.func @transform_5(%arg0: i32) -> (i32, i32) {
    %c0_i32 = arith.constant 0 : i32
    %c0_i32_0 = arith.constant 0 : i32
    %c0_i32_1 = arith.constant 0 : i32
    return %c0_i32, %c0_i32_0 : i32, i32
  }
  func.func @transform_6(%arg0: i32) -> (i32, i32) {
    %c0_i32 = arith.constant 0 : i32
    %c0_i32_0 = arith.constant 0 : i32
    %c0_i32_1 = arith.constant 0 : i32
    return %c0_i32, %c0_i32_0 : i32, i32
  }
  func.func @transform_7(%arg0: i32) -> (i32, i32) {
    %c0_i32 = arith.constant 0 : i32
    %c0_i32_0 = arith.constant 0 : i32
    %c0_i32_1 = arith.constant 0 : i32
    return %c0_i32, %c0_i32_0 : i32, i32
  }
  func.func @transform_8(%arg0: i32) -> (i32, i32) {
    %c0_i32 = arith.constant 0 : i32
    %c0_i32_0 = arith.constant 0 : i32
    %c0_i32_1 = arith.constant 0 : i32
    return %c0_i32, %c0_i32_0 : i32, i32
  }
  func.func @transform_9(%arg0: i32) -> (i32, i32) {
    %c0_i32 = arith.constant 0 : i32
    %c0_i32_0 = arith.constant 0 : i32
    %c0_i32_1 = arith.constant 0 : i32
    return %c0_i32, %c0_i32_0 : i32, i32
  }
  func.func @transform_10(%arg0: i32) -> (i32, i32) {
    %c0_i32 = arith.constant 0 : i32
    %c0_i32_0 = arith.constant 0 : i32
    %c0_i32_1 = arith.constant 0 : i32
    return %c0_i32, %c0_i32_0 : i32, i32
  }
  func.func @transform_11(%arg0: i32) -> (i32, i32) {
    %c0_i32 = arith.constant 0 : i32
    %c0_i32_0 = arith.constant 0 : i32
    %c0_i32_1 = arith.constant 0 : i32
    return %c0_i32, %c0_i32_0 : i32, i32
  }
  func.func @transform_12(%arg0: i32) -> (i32, i32) {
    %c0_i32 = arith.constant 0 : i32
    %c0_i32_0 = arith.constant 0 : i32
    %c0_i32_1 = arith.constant 0 : i32
    return %c0_i32, %c0_i32_0 : i32, i32
  }
  func.func @transform_13(%arg0: i32) -> (i32, i32) {
    %c0_i32 = arith.constant 0 : i32
    %c0_i32_0 = arith.constant 0 : i32
    %c0_i32_1 = arith.constant 0 : i32
    return %c0_i32, %c0_i32_0 : i32, i32
  }
  func.func @transform_14(%arg0: i32) -> (i32, i32) {
    %c0_i32 = arith.constant 0 : i32
    %c0_i32_0 = arith.constant 0 : i32
    %c0_i32_1 = arith.constant 0 : i32
    return %c0_i32, %c0_i32_0 : i32, i32
  }
  func.func @transform_15(%arg0: i32) -> (i32, i32) {
    %c0_i32 = arith.constant 0 : i32
    %c0_i32_0 = arith.constant 0 : i32
    %c0_i32_1 = arith.constant 0 : i32
    return %c0_i32, %c0_i32_0 : i32, i32
  }
  func.func @transform_16(%arg0: i32) -> (i32, i32) {
    %c0_i32 = arith.constant 0 : i32
    %c0_i32_0 = arith.constant 0 : i32
    %c0_i32_1 = arith.constant 0 : i32
    return %c0_i32, %c0_i32_0 : i32, i32
  }
  func.func @transform_17(%arg0: i32) -> (i32, i32) {
    %c0_i32 = arith.constant 0 : i32
    %c0_i32_0 = arith.constant 0 : i32
    %c0_i32_1 = arith.constant 0 : i32
    return %c0_i32, %c0_i32_0 : i32, i32
  }
  func.func @transform_18(%arg0: i32) -> (i32, i32) {
    %c0_i32 = arith.constant 0 : i32
    %c0_i32_0 = arith.constant 0 : i32
    %c0_i32_1 = arith.constant 0 : i32
    return %c0_i32, %c0_i32_0 : i32, i32
  }
  func.func @transform_19(%arg0: i32) -> (i32, i32, i32) {
    %c0_i32 = arith.constant 0 : i32
    %c0_i32_0 = arith.constant 0 : i32
    %c0_i32_1 = arith.constant 0 : i32
    return %arg0, %c0_i32, %c0_i32_0 : i32, i32, i32
  }
}

</mosaic_0001>

<bundles_post_ra>
// kernel: mra_bgcn_forward.1
= control target key start
LH: loop header
LB: loop body
LE: loop exit
PB: predicated region body
PF: predicated region fallthrough
CT: control target
= control target key end

     0   :  { %s3524_s0 = inlined_call_operand.vmem [shape: f32[2,8,4], index: 0, kind: input, shape index: {}]   ;;  %s3525_s1 = inlined_call_operand.vmem [shape: f32[8,8], index: 1, kind: input, shape index: {}]   ;;  %s3526_s2 = inlined_call_operand.vmem [shape: f32[12,12], index: 2, kind: input, shape index: {}]   ;;  %s3527_s3 = inlined_call_operand.vmem [shape: f32[12,8], index: 3, kind: input, shape index: {}]   ;;  %s3528_s4 = inlined_call_operand.vmem [shape: f32[8,12], index: 4, kind: input, shape index: {}]   ;;  %s3529_s5 = inlined_call_operand.vmem [shape: f32[4,8], index: 5, kind: input, shape index: {}]   ;;  %s3530_s6 = inlined_call_operand.vmem [shape: f32[8,8], index: 6, kind: input, shape index: {}]   ;;  %s3531_s7 = inlined_call_operand.vmem [shape: f32[1,8], index: 7, kind: input, shape index: {}]   ;;  %s3532_s8 = inlined_call_operand.vmem [shape: f32[4,16], index: 8, kind: input, shape index: {}]   ;;  %s3533_s9 = inlined_call_operand.vmem [shape: f32[1,16], index: 9, kind: input, shape index: {}]   ;;  %s3534_s10 = inlined_call_operand.vmem [shape: f32[8,8], index: 10, kind: input, shape index: {}]   ;;  %s3535_s11 = inlined_call_operand.vmem [shape: f32[1,8], index: 11, kind: input, shape index: {}]   ;;  %s3536_s12 = inlined_call_operand.vmem [shape: f32[24,16], index: 12, kind: input, shape index: {}]   ;;  %s3537_s13 = inlined_call_operand.vmem [shape: f32[1,16], index: 13, kind: input, shape index: {}]   ;;  %s3538_s14 = inlined_call_operand.vmem [shape: f32[8,8], index: 14, kind: input, shape index: {}]   ;;  %s3539_s15 = inlined_call_operand.vmem [shape: f32[1,8], index: 15, kind: input, shape index: {}]   ;;  %s3540_s16 = inlined_call_operand.vmem [shape: f32[24,16], index: 16, kind: input, shape index: {}]   ;;  %s3541_s17 = inlined_call_operand.vmem [shape: f32[1,16], index: 17, kind: input, shape index: {}]   ;;  %s3542_s18 = inlined_call_operand.vmem [shape: f32[16,1], index: 18, kind: input, shape index: {}]   ;;  %s3543_s19 = inlined_call_operand.hbm [shape: f32[2,8,16], index: 19, kind: output, shape index: {}]  }
   0x1   :  { %3552 = sst [smem:[#allocation11_spill]] %s3524_s0 }
   0x2   :  { %3553 = sst [smem:[#allocation12_spill]] %s3525_s1 }
   0x3   :  { %3554 = sst [smem:[#allocation13_spill]] %s3526_s2 }
   0x4   :  { %3555 = sst [smem:[#allocation14_spill]] %s3527_s3 }
   0x5   :  { %3556 = sst [smem:[#allocation15_spill]] %s3528_s4 }
   0x6   :  { %3557 = sst [smem:[#allocation16_spill]] %s3529_s5 }
   0x7   :  { %24 = vsyncpa [#allocation4], 0 }
   0x8   :  { %26 = vsyncpa [#allocation4 + $0x1], 0  ;;  %s3213_s0 = smov 0   ;;  %s3215_s30 = smov 0  }
   0x9   :  { %s3217_s20 = smov 0   ;;  %s3219_s21 = smov 0  }
   0xa LB: > { %3558 = sst [smem:[#allocation6_spill]] %s3094_s0  ;;  %s3234_s1 = sadd.s32 4294967295, %s3106_s21   ;;  %s3106_s21 = sphi %s3219_s21, %s3573_s21   ;;  %s3102_s20 = sphi %s3217_s20, %s3575_s20   ;;  %s3098_s30 = sphi %s3215_s30, %s3577_s30   ;;  %s3094_s0 = sphi %s3213_s0, %s3576_s0  }
   0xb   : > { %3559 = sst [smem:[#allocation7_spill]] %s3102_s20  ;;  %s2700_s22 = sadd.s32 4294967294, %s3106_s21  }
   0xc   : > { %s3238_s2 = sadd.s32 1, %s3106_s21   ;;  %s443_s23 = sadd.s32 1, %s3102_s20 }
   0xd   : > { %3560 = sst [smem:[#allocation8_spill]] %s3238_s2  ;;  %s440_s24 = ssub.s32 %s3106_s21, %s3238_s2 }
   0xe   : > { %p453_p0 = scmp.ne.s32.totalorder %s3102_s20, %s3098_s30  ;;  %p441_p1 = scmp.eq.s32.totalorder %s440_s24, 0 }
   0xf   : > { %p454_p2 = scmp.eq.s32.totalorder %s3234_s1, 1  ;;  %p459_p3 = scmp.ne.s32.totalorder %s3098_s30, %s3094_s0 }
  0x10   : > { %p460_p4 = scmp.eq.s32.totalorder %s2700_s22, 1  ;;  %p2703_p7 = scmp.ge.s32.totalorder %s3106_s21, 1 }
  0x11   : > { %s3249_s25 = scalar_select %p441_p1, %s3102_s20, %s443_s23  }
  0x12   : > { %p3251_p5 = por %p454_p2, %p453_p0  ;;  %p3255_p6 = por %p460_p4, %p459_p3 }
  0x13   : > { %3561 = sst [smem:[#allocation9_spill]] %s3249_s25  ;;  %p539_p8 = scmp.lt.s32.totalorder %s3106_s21, 3 }
  0x14   : > { %s3563_s26 = scalar_select %p3255_p6, 1, 0 }
  0x15   : > { %p540_p9 = pnand %p2703_p7, %p539_p8 }
  0x16   : > { %3564 = sst [smem:[#allocation10_spill]] %s3563_s26  ;;  %p594_p10 = scmp.lt.s32.totalorder (!%p540_p9), %s3234_s1, 1 }
  0x17   : > { %543 = sbr.rel (%p540_p9) target bundleno = 4189 (0x105d), region = 96  ;;  %s3565_s29 = sld [smem:[#allocation14_spill]] (!%p540_p9) }
  0x18   : > { %s3566_s20 = sld [smem:[#allocation11_spill]] (!%p540_p9)  ;;  %s3110_s26 = smov (!%p540_p9), 16  }
  0x19   : > { %s3567_s5 = sld [smem:[#allocation16_spill]] (!%p540_p9) }
  0x1a   : > { %s3569_s28 = sld [smem:[#allocation12_spill]] (!%p540_p9) }
  0x1b   : > { %s3570_s4 = sld [smem:[#allocation15_spill]] (!%p540_p9) }
  0x1c   : > { %vm601_vm0 = vcmask 64512   ;;  %s595_s22 = scalar_select %p594_p10, %s3234_s1, 1  ;;  %vm691_vm1 = vcmask 1043456   ;;  %vm684_vm2 = vcmask 31744   ;;  %vm773_vm3 = vcmask 97280   ;;  %v858_v10 = vld [vmem:[%s3530_s6] sm:$0xff] }
  0x1d   : > { %v599_v0 = vld [vmem:[%s3565_s29] sm:$0xff]  ;;  %v600_v2 = vld [vmem:[%s3565_s29 + $0x8] sm:$0xf]  ;;  %v3108_v13 = vmov 0.0   ;;  %vm3109_vm4 = vmmov 0   ;;  %vm1431_vm5 = vcmask 130048  }
  0x1e   : > { %2840 = vmatprep.mubr.msk.f32.mxu0 %vm601_vm0, %v599_v0  ;;  %s2705_s23 = sshll.u32 %s595_s22, 3  ;;  %v1022_v15 = vld [vmem:[%s3532_s8] sm:$0xf]  ;;  %vm1437_vm6 = vcmask 195712   ;;  %v1582_v47 = vld [vmem:[%s3536_s12 + $0x10] sm:$0xff]  ;;  %v1581_v48 = vld [vmem:[%s3536_s12 + $0x8] sm:$0xff] }
  0x1f   : > { %s597_s2 = scalar_lea.vmem %s3566_s20, %s2705_s23  ;;  %v683_v3 = vld [vmem:[%s3567_s5] sm:$0xf]  ;;  %vm1590_vm7 = vcmask 195584   ;;  %s591_s20 = sand.u32 1, %s3098_s30  }
  0x20   : > { %v598_v1 = vld [vmem:[%s597_s2] sm:$0xff]  ;;  %2843 = vmatprep.subr.msk.mxu1 %vm691_vm1, %v683_v3  ;;  %s3568_s2 = sld [smem:[#allocation13_spill]]  ;;  %s2704_s25 = sshll.u32 %s591_s20, 3 }
  0x21   : > { %2838 = vmatprep.subr.mxu0 %v598_v1  ;;  %2844 = vmatpush3.msk.msra.mxu1 %vm691_vm1, %v683_v3  ;;  %v3309_v14 = vld [vmem:[%s3569_s28] sm:$0xff]  ;;  %s2759_s22 = sshll.u32 %s3234_s1, 7  ;;  %s593_s23 = scalar_lea.vmem [#allocation3], %s2704_s25 }
  0x22   : > { %2839 = vmatpush3.msra.mxu0 %v598_v1  ;;  %2855 = vmatprep.subr.mxu1 %v858_v10  ;;  %v2714_v16 = vld [vmem:[%s3531_s7] ss:$0 sm:$0xff]  ;;  %s2641_s24 = sshll.u32 %s593_s23, 4  ;;  %s2639_s28 = scalar_lea.hbm %s3543_s19, %s2759_s22  ;;  %s2642_s24 = int_to_ptr.vmem [resolvable:$true] %s2641_s24 }
  0x23   : > { %2841 = vmatmul.mubr.msk.f32.vlgmr.msra.gmra.mxu0 %vm601_vm0, %v600_v2  ;;  %v2718_v27 = vld [vmem:[%s3533_s9] ss:$0 sm:$0xff]  ;;  %s2628_s0 = scalar_lea.sflag [#allocation4], %s591_s20 }
  0x24   : > { %v1263_v32 = vld [vmem:[%s3534_s10] sm:$0xff] }
  0x25   : > { %v2727_v35 = vld [vmem:[%s3535_s11] ss:$0 sm:$0xff] }
  0x26   : > { %v3284_v6 = vld [vmem:[%s3568_s2] sm:$0xff]  ;;  %v3293_v9 = vld [vmem:[%s3568_s2 + $0x8] sm:$0xf]  ;;  %s3046_s2 = scalar_lea.vmem %s2642_s24, 128 }
  0x27   : > { %2852 = vmatprep.mubr.msk.f32.mxu0 %vm773_vm3, %v3284_v6  ;;  %v3360_v42 = vld [vmem:[%s3570_s4] sm:$0xff]  ;;  %p3047_p11 = scmp.ne.s32.totalorder %s2642_s24, %s3046_s2  ;;  %s3112_s4 = smov [#allocation3]  }
  0x28   : > { %v1580_v51 = vld [vmem:[%s3536_s12] sm:$0xff]  ;;  %s3050_s1 = sshll.u32 %s3112_s4, 4  ;;  %s3051_s1 = int_to_ptr.vmem [resolvable:$false] %s3050_s1 }
  0x29   : > { %v2734_v56 = vld [vmem:[%s3537_s13] ss:$0 sm:$0xff]  ;;  %p3048_p12 = pnand %p3047_p11, %p3251_p5  ;;  %s3052_s25 = scalar_lea.vmem %s3051_s1, 256 }
  0x2a   : > { %v1896_v63 = vld [vmem:[%s3538_s14] sm:$0xff]  ;;  %p3053_p0 = scmp.lt.s32.totalorder %s2642_s24, %s3051_s1  ;;  %p3054_p1 = scmp.lt.s32.totalorder %s3052_s25, %s3046_s2 }
  0x2b   : > { %v2745_v2 = vld [vmem:[%s3539_s15] ss:$0 sm:$0xff]  ;;  %p3049_p13 = pneg %p3048_p12 }
  0x2c   : > { %p3055_p2 = por %p3054_p1, %p3053_p0 }
  0x2e   : > { %p3056_p3 = pnand %p3055_p2, %p3049_p13 }
  0xe3   : > { %v2842_v4 = vpop.f32.mrf.mxu0 }
  0xe5   : > { %v674_v5 = vpop.f32.mrf.mxu0 }
  0xe6   : > { %2845 = vmatprep.mubr.msk.f32.mxu1 %vm684_vm2, %v674_v5 }
  0xe7   : > { %2846 = vmatmul.mubr.msk.f32.vlgmr.msra.gmra.mxu1 %vm684_vm2, %v2842_v4 }
  0xe8   : > { %2856 = vmatpush3.msra.mxu1 %v858_v10 }
  0xe9   : > { %2865 = vmatprep.subr.mxu1 %v3108_v13 }
 0x1a7   : > { %v2847_v7 = vpop.f32.mrf.mxu1 }
 0x1a8   : > { %2848 = vmatprep.subr.msk.mxu0 %vm691_vm1, %v2847_v7 }
 0x1a9   : > { %v761_v8 = vpop.f32.mrf.mxu1  ;;  %2849 = vmatpush3.msk.msra.mxu0 %vm691_vm1, %v2847_v7 }
 0x1aa   : > { %2850 = vmatprep.subr.mxu0 %v761_v8 }
 0x1ab   : > { %2851 = vmatpush3.msra.mxu0 %v761_v8 }
 0x1ac   : > { %2853 = vmatmul.mubr.msk.f32.vlgmr.msra.gmra.mxu0 %vm773_vm3, %v3293_v9  ;;  %2860 = vmatprep.subr.mxu0 %v3108_v13 }
 0x1ad   : > { %2861 = vmatpush3.msra.mxu0 %v598_v1  ;;  %2862 = vmatprep.mubr.msk.f32.mxu0 %vm3109_vm4, %v3108_v13 }
 0x1b0   : > { %2863 = vmatmul.mubr.msk.f32.vlgmr.msra.gmra.mxu0 %vm601_vm0, %v3309_v14 }
 0x1b1   : > { %2874 = vmatprep.mubr.msk.f32.mxu0 %vm773_vm3, %v3284_v6 }
 0x26c   : > { %v2854_v11 = vpop.f32.mrf.mxu0 }
 0x26e   : > { %v849_v12 = vpop.f32.mrf.mxu0 }
 0x26f   : > { %2857 = vmatprep.mubr.msk.f32.mxu1 %vm601_vm0, %v849_v12 }
 0x270   : > { %2858 = vmatmul.mubr.msk.f32.vlgmr.msra.gmra.mxu1 %vm601_vm0, %v2854_v11  ;;  %v1018_v23 = vpop.f32.mrf.mxu0 }
 0x271   : > { %2867 = vmatprep.mubr.msk.f32.mxu1 %vm3109_vm4, %v3108_v13  ;;  %2866 = vmatpush3.msk.msra.mxu1 %vm691_vm1, %v1022_v15 }
 0x272   : > { %v2864_v24 = vpop.f32.mrf.mxu0 }
 0x274   : > { %2868 = vmatmul.mubr.msk.f32.vlgmr.msra.gmra.mxu1 %vm684_vm2, %v1018_v23 }
 0x275   : > { %2881 = vmatprep.mubr.msk.f32.mxu1 %vm773_vm3, %v3284_v6 }
 0x330   : > { %v2859_v17 = vpop.f32.mrf.mxu1 }
 0x331   : > { %v944_v18 = vadd.f32 %v2859_v17, %v2714_v16  ;;  %v2283_v17 = vld [vmem:[%s3540_s16 + $0x10] sm:$0xff] }
 0x332   : > { %v938_v19 = vpop.f32.mrf.mxu1 }
 0x333   : > { %v948_v20 = vmax.f32 %v944_v18, 0.0  ;;  %v939_v21 = vadd.f32 %v2714_v16, %v938_v19  ;;  %v2282_v18 = vld [vmem:[%s3540_s16 + $0x8] sm:$0xff] }
 0x334   : > { %v1102_v28 = vpop.f32.mrf.mxu1 }
 0x335   : > { %v947_v22 = vmax.f32 %v939_v21, 0.0  ;;  %2870 = vmatprep.subr.msk.mxu0 %vm691_vm1, %v948_v20  ;;  %v1103_v29 = vadd.f32 %v2718_v27, %v1102_v28  ;;  %v2753_v27 = vld [vmem:[%s3541_s17] ss:$0 sm:$0xff] }
 0x336   : > { %2871 = vmatpush3.msk.msra.mxu0 %vm691_vm1, %v948_v20  ;;  %v2869_v30 = vpop.f32.mrf.mxu1  ;;  %v2366_v20 = vld [vmem:[%s3542_s18 + $0x8] sm:$0xff] }
 0x337   : > { %2872 = vmatprep.subr.mxu0 %v947_v22  ;;  %v3341_v31 = vmax.f32 %v1103_v29, 0.0 }
 0x338   : > { %2873 = vmatpush3.msra.mxu0 %v947_v22  ;;  %v2365_v22 = vld [vmem:[%s3542_s18] sm:$0xff] }
 0x339   : > { %2875 = vmatmul.mubr.msk.f32.vlgmr.msra.gmra.mxu0 %vm773_vm3, %v3293_v9  ;;  %1432 = vst.msk [vmem:[#allocation2] sm:$0xff] %vm1431_vm5, %v3341_v31  ;;  %2884 = vmatprep.subr.mxu0 %v1263_v32 }
 0x33a   : > { %2885 = vmatpush3.msra.mxu0 %v1263_v32 }
 0x33b   : > { %2896 = vmatprep.subr.mxu0 %v3108_v13 }
 0x3f9   : > { %v2876_v25 = vpop.f32.mrf.mxu0 }
 0x3fa   : > { %2877 = vmatprep.subr.msk.mxu1 %vm691_vm1, %v2876_v25 }
 0x3fb   : > { %v1176_v26 = vpop.f32.mrf.mxu0  ;;  %2878 = vmatpush3.msk.msra.mxu1 %vm691_vm1, %v2876_v25 }
 0x3fc   : > { %2879 = vmatprep.subr.mxu1 %v1176_v26 }
 0x3fd   : > { %2880 = vmatpush3.msra.mxu1 %v1176_v26 }
 0x3fe   : > { %2882 = vmatmul.mubr.msk.f32.vlgmr.msra.gmra.mxu1 %vm773_vm3, %v3293_v9  ;;  %2889 = vmatprep.subr.mxu1 %v3108_v13 }
 0x3ff   : > { %2893 = vmatprep.mubr.msk.f32.mxu1 %vm3109_vm4, %v3108_v13 }
 0x4be   : > { %v2883_v33 = vpop.f32.mrf.mxu1 }
 0x4c0   : > { %v1254_v34 = vpop.f32.mrf.mxu1 }
 0x4c1   : > { %2886 = vmatprep.mubr.msk.f32.mxu0 %vm601_vm0, %v1254_v34 }
 0x4c2   : > { %2887 = vmatmul.mubr.msk.f32.vlgmr.msra.gmra.mxu0 %vm601_vm0, %v2883_v33 }
 0x4c3   : > { %2898 = vmatprep.mubr.msk.f32.mxu0 %vm3109_vm4, %v3108_v13 }
 0x582   : > { %v2888_v36 = vpop.f32.mrf.mxu0 }
 0x583   : > { %v1349_v37 = vadd.f32 %v2888_v36, %v2727_v35 }
 0x584   : > { %v1343_v38 = vpop.f32.mrf.mxu0 }
 0x585   : > { %v1353_v39 = vmax.f32 %v1349_v37, 0.0  ;;  %v1344_v40 = vadd.f32 %v2727_v35, %v1343_v38  ;;  %v3111_v35 = vmov 0  }
 0x586   : > { %3037 = vset.pattern.permute.xlu0 %v3111_v35  ;;  %3036 = vset.pattern.permute.xlu1 %v3111_v35 }
 0x587   : > { %v1352_v41 = vmax.f32 %v1344_v40, 0.0  ;;  %2890 = vmatpush3.msk.msra.mxu1 %vm691_vm1, %v1353_v39 }
 0x588   : > { %2891 = vmatprep.subr.mxu1 %v3108_v13 }
 0x589   : > { %2892 = vmatpush3.msra.mxu1 %v1352_v41 }
 0x58a   : > { %2894 = vmatmul.mubr.msk.f32.vlgmr.msra.gmra.mxu1 %vm773_vm3, %v3360_v42  ;;  %2901 = vmatprep.subr.mxu1 %v3108_v13 }
 0x58b   : > { %2903 = vmatprep.mubr.msk.f32.mxu1 %vm3109_vm4, %v3108_v13 }
 0x64a   : > { %v1427_v43 = vpop.f32.mrf.mxu1 }
 0x64b   : > { %1434 = vrot.lane.b32.xlu0 %v1427_v43, %s3110_s26 }
 0x64c   : > { %v2895_v44 = vpop.f32.mrf.mxu1 }
 0x6bd   : > { %v1435_v45 = vpop.permute.xlu0 %1434 }
 0x6be   : > { %1438 = vst.msk [vmem:[#allocation2] sm:$0xff] %vm1437_vm6, %v1435_v45 }
 0x6c5   : > { %v1439_v46 = vld [vmem:[#allocation2] sm:$0xff] }
 0x6c6   : > { %2897 = vmatpush3.msra.mxu0 %v1439_v46 }
 0x6c7   : > { %2899 = vmatmul.mubr.msk.f32.vlgmr.msra.gmra.mxu0 %vm601_vm0, %v3309_v14  ;;  %2906 = vmatprep.subr.mxu0 %v3108_v13 }
 0x6c8   : > { %2912 = vmatprep.mubr.msk.f32.mxu0 %vm3109_vm4, %v3108_v13  ;;  %2907 = vmatpush3.msra.mxu0 %v1582_v47 }
 0x6c9   : > { %2908 = vmatprep.subr.mxu0 %v3108_v13 }
 0x6ca   : > { %2909 = vmatpush3.msra.mxu0 %v1581_v48 }
 0x6cb   : > { %2910 = vmatprep.subr.mxu0 %v3108_v13 }
 0x6cc   : > { %2911 = vmatpush3.msra.mxu0 %v1580_v51 }
 0x787   : > { %v1506_v49 = vpop.f32.mrf.mxu0 }
 0x788   : > { %2902 = vmatpush3.msra.mxu1 %v1506_v49 }
 0x789   : > { %v2900_v50 = vpop.f32.mrf.mxu0  ;;  %2904 = vmatmul.mubr.msk.f32.vlgmr.msra.gmra.mxu1 %vm601_vm0, %v3309_v14  ;;  %2915 = vmatprep.subr.msk.mxu1 %vm691_vm1, %v1353_v39 }
 0x78a   : > { %2916 = vmatpush3.msk.msra.mxu1 %vm691_vm1, %v1353_v39  ;;  %2919 = vmatprep.mubr.msk.f32.mxu1 %vm773_vm3, %v3284_v6 }
 0x78b   : > { %2917 = vmatprep.subr.mxu1 %v1352_v41 }
 0x78c   : > { %2918 = vmatpush3.msra.mxu1 %v1352_v41 }
 0x78d   : > { %2920 = vmatmul.mubr.msk.f32.vlgmr.msra.gmra.mxu1 %vm773_vm3, %v3293_v9 }
 0x78e   : > { %2926 = vmatprep.mubr.msk.f32.mxu1 %vm773_vm3, %v3284_v6 }
 0x849   : > { %v1576_v52 = vpop.f32.mrf.mxu1 }
 0x84a   : > { %2913 = vmatmul.mubr.msk.f32.vlgmr.msra.gmra.mxu0 %vm1590_vm7, %v1576_v52 }
 0x84b   : > { %v2905_v53 = vpop.f32.mrf.mxu1  ;;  %2933 = vmatprep.mubr.msk.f32.mxu0 %vm773_vm3, %v3284_v6 }
 0x84d   : > { %v2921_v54 = vpop.f32.mrf.mxu1 }
 0x84e   : > { %2922 = vmatprep.subr.msk.mxu1 %vm691_vm1, %v2921_v54 }
 0x84f   : > { %v1731_v55 = vpop.f32.mrf.mxu1  ;;  %2923 = vmatpush3.msk.msra.mxu1 %vm691_vm1, %v2921_v54 }
 0x850   : > { %2924 = vmatprep.subr.mxu1 %v1731_v55 }
 0x851   : > { %2925 = vmatpush3.msra.mxu1 %v1731_v55 }
 0x852   : > { %2927 = vmatmul.mubr.msk.f32.vlgmr.msra.gmra.mxu1 %vm773_vm3, %v3293_v9  ;;  %2936 = vmatprep.subr.mxu1 %v1896_v63 }
 0x853   : > { %2937 = vmatpush3.msra.mxu1 %v1896_v63 }
 0x854   : > { %2948 = vmatprep.subr.mxu1 %v3108_v13 }
 0x90a   : > { %v1660_v57 = vpop.f32.mrf.mxu0 }
 0x90b   : > { %v1661_v58 = vadd.f32 %v2734_v56, %v1660_v57 }
 0x90c   : > { %v2914_v59 = vpop.f32.mrf.mxu0 }
 0x90d   : > { %v3406_v60 = vmax.f32 %v1661_v58, 0.0 }
 0x90f   : > { %2064 = vst.msk [vmem:[#allocation2] sm:$0xff] %vm1431_vm5, %v3406_v60 }
 0x912   : > { %v2928_v61 = vpop.f32.mrf.mxu1 }
 0x913   : > { %2929 = vmatprep.subr.msk.mxu0 %vm691_vm1, %v2928_v61 }
 0x914   : > { %v1809_v62 = vpop.f32.mrf.mxu1  ;;  %2930 = vmatpush3.msk.msra.mxu0 %vm691_vm1, %v2928_v61 }
 0x915   : > { %2931 = vmatprep.subr.mxu0 %v1809_v62 }
 0x916   : > { %2932 = vmatpush3.msra.mxu0 %v1809_v62 }
 0x917   : > { %2934 = vmatmul.mubr.msk.f32.vlgmr.msra.gmra.mxu0 %vm773_vm3, %v3293_v9  ;;  %2941 = vmatprep.subr.mxu0 %v3108_v13 }
 0x918   : > { %2945 = vmatprep.mubr.msk.f32.mxu0 %vm3109_vm4, %v3108_v13 }
 0x9d7   : > { %v2935_v0 = vpop.f32.mrf.mxu0 }
 0x9d9   : > { %v1887_v1 = vpop.f32.mrf.mxu0 }
 0x9da   : > { %2938 = vmatprep.mubr.msk.f32.mxu1 %vm601_vm0, %v1887_v1 }
 0x9db   : > { %2939 = vmatmul.mubr.msk.f32.vlgmr.msra.gmra.mxu1 %vm601_vm0, %v2935_v0 }
 0x9dc   : > { %2950 = vmatprep.mubr.msk.f32.mxu1 %vm3109_vm4, %v3108_v13 }
 0xa9b   : > { %v2940_v3 = vpop.f32.mrf.mxu1 }
 0xa9c   : > { %v1982_v4 = vadd.f32 %v2940_v3, %v2745_v2 }
 0xa9d   : > { %v1976_v5 = vpop.f32.mrf.mxu1 }
 0xa9e   : > { %v1986_v6 = vmax.f32 %v1982_v4, 0.0  ;;  %v1977_v7 = vadd.f32 %v2745_v2, %v1976_v5 }
 0xaa0   : > { %v1985_v8 = vmax.f32 %v1977_v7, 0.0  ;;  %2942 = vmatpush3.msk.msra.mxu0 %vm691_vm1, %v1986_v6 }
 0xaa1   : > { %2943 = vmatprep.subr.mxu0 %v3108_v13 }
 0xaa2   : > { %2944 = vmatpush3.msra.mxu0 %v1985_v8 }
 0xaa3   : > { %2946 = vmatmul.mubr.msk.f32.vlgmr.msra.gmra.mxu0 %vm773_vm3, %v3360_v42  ;;  %2953 = vmatprep.subr.mxu0 %v3108_v13 }
 0xaa4   : > { %2955 = vmatprep.mubr.msk.f32.mxu0 %vm3109_vm4, %v3108_v13 }
 0xb63   : > { %v2060_v9 = vpop.f32.mrf.mxu0 }
 0xb64   : > { %2066 = vrot.lane.b32.xlu0 %v2060_v9, %s3110_s26 }
 0xb65   : > { %v2947_v10 = vpop.f32.mrf.mxu0 }
 0xbd6   : > { %v2067_v11 = vpop.permute.xlu0 %2066 }
 0xbd7   : > { %2069 = vst.msk [vmem:[#allocation2] sm:$0xff] %vm1437_vm6, %v2067_v11 }
 0xbde   : > { %v2070_v12 = vld [vmem:[#allocation2] sm:$0xff] }
 0xbdf   : > { %2949 = vmatpush3.msra.mxu1 %v2070_v12 }
 0xbe0   : > { %2951 = vmatmul.mubr.msk.f32.vlgmr.msra.gmra.mxu1 %vm601_vm0, %v3309_v14  ;;  %2958 = vmatprep.subr.mxu1 %v3108_v13 }
 0xbe1   : > { %2960 = vmatprep.mubr.msk.f32.mxu1 %vm3109_vm4, %v3108_v13 }
 0xca0   : > { %v2137_v15 = vpop.f32.mrf.mxu1 }
 0xca1   : > { %2954 = vmatpush3.msra.mxu0 %v2137_v15 }
 0xca2   : > { %v2952_v16 = vpop.f32.mrf.mxu1  ;;  %2956 = vmatmul.mubr.msk.f32.vlgmr.msra.gmra.mxu0 %vm601_vm0, %v3309_v14  ;;  %2963 = vmatprep.subr.mxu0 %v3108_v13 }
 0xca3   : > { %2969 = vmatprep.mubr.msk.f32.mxu0 %vm3109_vm4, %v3108_v13  ;;  %2964 = vmatpush3.msra.mxu0 %v2283_v17 }
 0xca4   : > { %2965 = vmatprep.subr.mxu0 %v3108_v13 }
 0xca5   : > { %2966 = vmatpush3.msra.mxu0 %v2282_v18 }
 0xca6   : > { %2967 = vmatprep.subr.mxu0 %v3108_v13 }
 0xd62   : > { %v2207_v19 = vpop.f32.mrf.mxu0 }
 0xd63   : > { %2959 = vmatpush3.msra.mxu1 %v2207_v19 }
 0xd64   : > { %v2957_v21 = vpop.f32.mrf.mxu0  ;;  %2961 = vmatmul.mubr.msk.f32.vlgmr.msra.gmra.mxu1 %vm601_vm0, %v3309_v14  ;;  %2972 = vmatprep.subr.mxu1 %v3108_v13  ;;  %v2281_v14 = vld [vmem:[%s3540_s16] sm:$0xff] }
 0xd65   : > { %2973 = vmatpush3.msra.mxu1 %v2366_v20  ;;  %2976 = vmatprep.mubr.msk.f32.mxu1 %vm3109_vm4, %v3108_v13 }
 0xd66   : > { %2974 = vmatprep.subr.mxu1 %v3108_v13  ;;  %2968 = vmatpush3.msra.mxu0 %v2281_v14 }
 0xd67   : > { %2975 = vmatpush3.msra.mxu1 %v2365_v22  ;;  %2979 = vmatprep.subr.mxu0 %v3108_v13 }
 0xd68   : > { %2977 = vmatmul.mubr.msk.f32.vlgmr.msra.gmra.mxu1 %vm1431_vm5, %v3341_v31  ;;  %2986 = vmatprep.subr.mxu1 %v3108_v13 }
 0xd69   : > { %2987 = vmatpush3.msra.mxu1 %v2366_v20  ;;  %2990 = vmatprep.mubr.msk.f32.mxu1 %vm3109_vm4, %v3108_v13 }
 0xd6a   : > { %2988 = vmatprep.subr.mxu1 %v3108_v13 }
 0xd6b   : > { %2989 = vmatpush3.msra.mxu1 %v2365_v22 }
 0xe24   : > { %v2277_v23 = vpop.f32.mrf.mxu1 }
 0xe25   : > { %2970 = vmatmul.mubr.msk.f32.vlgmr.msra.gmra.mxu0 %vm1590_vm7, %v2277_v23 }
 0xe26   : > { %v2962_v24 = vpop.f32.mrf.mxu1  ;;  %2980 = vmatpush3.msra.mxu0 %v2366_v20  ;;  %2983 = vmatprep.mubr.msk.f32.mxu0 %vm3109_vm4, %v3108_v13 }
 0xe27   : > { %2981 = vmatprep.subr.mxu0 %v3108_v13 }
 0xe28   : > { %v2436_v25 = vpop.f32.mrf.mxu1  ;;  %2982 = vmatpush3.msra.mxu0 %v2365_v22 }
 0xe29   : > { %2984 = vmatmul.mubr.msk.f32.vlgmr.msra.gmra.mxu0 %vm1431_vm5, %v3406_v60 }
 0xe2a   : > { %v2978_v26 = vpop.f32.mrf.mxu1 }
 0xee5   : > { %v2360_v28 = vpop.f32.mrf.mxu0 }
 0xee6   : > { %v2361_v29 = vadd.f32 %v2753_v27, %v2360_v28 }
 0xee7   : > { %v2971_v30 = vpop.f32.mrf.mxu0 }
 0xee8   : > { %v2364_v32 = vmax.f32 %v2361_v29, 0.0 }
 0xee9   : > { %v2509_v33 = vpop.f32.mrf.mxu0 }
 0xeea   : > { %2991 = vmatmul.mubr.msk.f32.vlgmr.msra.gmra.mxu1 %vm1431_vm5, %v2364_v32  ;;  %v2586_v13 = vmax.f32 %v2436_v25, %v2509_v33 }
 0xeeb   : > { %v2985_v34 = vpop.f32.mrf.mxu0 }
 0xfaa   : > { %v2582_v36 = vpop.f32.mrf.mxu1 }
 0xfab   : > { %v2587_v37 = vmax.f32 %v2586_v13, %v2582_v36 }
 0xfac   : > { %v2992_v38 = vpop.f32.mrf.mxu1 }
 0xfad   : > { %v2588_v39 = vsub.f32 %v2436_v25, %v2587_v37  ;;  %v2591_v40 = vsub.f32 %v2509_v33, %v2587_v37  ;;  %v2594_v41 = vsub.f32 %v2582_v36, %v2587_v37 }
 0xfaf   : > { %v2589_v42 = vmul.f32 1.442695, %v2588_v39  ;;  %v2592_v43 = vmul.f32 1.442695, %v2591_v40  ;;  %v2595_v44 = vmul.f32 1.442695, %v2594_v41 }
 0xfb1   : > { %3038 = vpow2.f32 %v2589_v42 }
 0xfb2   : > { %3040 = vpow2.f32 %v2592_v43 }
 0xfb3   : > { %3042 = vpow2.f32 %v2595_v44 }
 0xfbe   : > { %v3039_v45 = vpop.eup %3038 }
 0xfbf   : > { %v3041_v46 = vpop.eup %3040 }
 0xfc0   : > { %2607 = vperm.xlu0 %3037, %v3041_v46   ;;  %v2597_v47 = vadd.f32 %v3041_v46, %v3039_v45  ;;  %v3043_v48 = vpop.eup %3042 }
 0xfc2   : > { %v2598_v49 = vadd.f32 %v3043_v48, %v2597_v47 }
 0xfc4   : > { %2621 = vperm.xlu1 %3036, %v2598_v49  }
 0xfc8   : > { %2601 = vperm.xlu1 %3036, %v3039_v45  }
 0xfcc   : > { %2614 = vperm.xlu1 %3036, %v3043_v48  }
0x103b   : > { %v2608_v52 = vpop.permute.xlu0 %2607 }
0x103c   : > { %v2610_v55 = vmul.f32 %v2608_v52, %v3406_v60 }
0x103f   : > { %v2622_v50 = vpop.permute.xlu1 %2621 }
0x1040   : > { %3044 = vrcp.f32 %v2622_v50 }
0x1043   : > { %v2602_v51 = vpop.permute.xlu1 %2601 }
0x1044   : > { %v2604_v53 = vmul.f32 %v2602_v51, %v3341_v31 }
0x1046   : > { %v2611_v57 = vadd.f32 %v2610_v55, %v2604_v53 }
0x1047   : > { %v2615_v54 = vpop.permute.xlu1 %2614 }
0x1048   : > { %v2617_v56 = vmul.f32 %v2615_v54, %v2364_v32 }
0x104a   : > { %v2618_v58 = vadd.f32 %v2617_v56, %v2611_v57 }
0x104d   : > { %v3045_v59 = vpop.eup %3044 }
0x104e   : > { %v2625_v61 = vmul.f32 %v3045_v59, %v2618_v58 }
0x1050   : > { %2626 = vst.msk [vmem:[%s593_s23] sm:$0xff] %vm1431_vm5, %v2625_v61 }
0x1051   : > { %3059 = shalt.err (!%p3056_p3)
}
0x1052   : > { %s3060_s27 = scalar_lea.hbm %s2639_s28, 128  ;;  %s3064_s23 = scalar_lea.hbm %s3543_s19, 256 }
0x1053   : > { %p3061_p4 = scmp.ne.s32.totalorder %s2639_s28, %s3060_s27  ;;  %p3065_p9 = scmp.lt.s32.totalorder %s2639_s28, %s3543_s19 }
0x1054   : > { %p3066_p10 = scmp.lt.s32.totalorder %s3064_s23, %s3060_s27 }
0x1055   : > { %p3062_p7 = pnand %p3061_p4, %p3251_p5 }
0x1056   : > { %p3067_p11 = por %p3066_p10, %p3065_p9 }
0x1057   : > { %p3063_p8 = pneg %p3062_p7 }
0x1059   : > { %p3068_p12 = pnand %p3067_p11, %p3063_p8 }
0x105b   : > { %3071 = shalt.err (!%p3068_p12)
}
0x105c   : > { %2993 = dma.vmem_to_hbm [thread:$0]  (%p3251_p5), %s2642_s24, 128, %s2639_s28, %s2628_s0  }
0x105d PF: > { %s3571_s4 = sld [smem:[#allocation6_spill]]  ;;  %p2999_p13 = scmp.ge.s32.totalorder %s3106_s21, 2 }
0x105f   : > { %p2996_p0 = pnand %p2999_p13, %p3255_p6 }
0x1061   : > { %p2997_p1 = pneg %p2996_p0 }
0x1063   : > { %s2653_s1 = sand.u32 1, %s3571_s4  }
0x1064   : > { %s2654_s25 = scalar_lea.sflag [#allocation4], %s2653_s1 }
0x1065   : > { %3089 = dma.done.wait (%p2997_p1), %s2654_s25, 128  }
0x1066   : > { %3091 = vsyncadd (%p2997_p1), %s2654_s25, 4294967168  ;;  %s3573_s21 = sld [smem:[#allocation8_spill]]  ;;  %s3576_s0 = smov %s3098_s30 }
0x1067   : > { %s3574_s5 = sld [smem:[#allocation7_spill]] }
0x1068   : > { %s3575_s20 = sld [smem:[#allocation9_spill]] }
0x106c   : > { %p29_p2 = scmp.ge.s32.totalorder %s3573_s21, 4  }
0x106d   : > { %s3577_s30 = smov %s3574_s5 }
0x106e   :  { %31 = sbr.rel (!%p29_p2) target bundleno = 10 (0xa), region = 131 }
0x1073   :  { %2659 = vsyncpa [#allocation4], 1 }
0x1074   :  { %2661 = vsyncpa [#allocation4 + $0x1], 1 }

</bundles_post_ra>
